<compile_context>
chip_gen: v5e
topology: v5e:2x2
jax: 0.10.0
libtpu: 0.0.40
codegen_flags: <defaults>
</compile_context>

<pallas_src>
import functools

import jax
import jax.numpy as jnp
from jax.experimental import pallas as pl
from jax.experimental.pallas import tpu as pltpu

_TB = 128  # samples per grid step (lane tile width)


# ---------------------------------------------------------------------------
# Kernels.  All refs are (rows, TB) with the batch on the lane axis; nf is a
# small static Python int so the loops fully unroll into VPU multiply-adds.
# ---------------------------------------------------------------------------
def _stress_kernel(nf, u_ref, t_ref, s_ref, bias_ref, out_ref):
    # view == 1: sigmoid(b_u + b_t + b_s + (u @ T) . s) * 5
    u = u_ref[...]           # (nf, TB)
    t = t_ref[...]           # (nf*nf, TB)   flattened row-major: T[k, j]
    s = s_ref[...]           # (nf, TB)      stress item factor (broadcast)
    acc = bias_ref[...]      # (1, TB)       pre-summed biases
    for j in range(nf):
        ut_j = u[0:1, :] * t[j:j + 1, :]
        for k in range(1, nf):
            ut_j = ut_j + u[k:k + 1, :] * t[k * nf + j:k * nf + j + 1, :]
        acc = acc + ut_j * s[j:j + 1, :]
    out_ref[...] = jax.nn.sigmoid(acc) * 5.0


def _rate_kernel(nf, u_ref, i_ref, bias_ref, out_ref):
    # view == 2: sigmoid(b_u + b_i + u . i) * 5
    u = u_ref[...]           # (nf, TB)
    it = i_ref[...]          # (nf, TB)
    acc = bias_ref[...]      # (1, TB)
    for k in range(nf):
        acc = acc + u[k:k + 1, :] * it[k:k + 1, :]
    out_ref[...] = jax.nn.sigmoid(acc) * 5.0


def _done_kernel(nf, u_ref, t_ref, i_ref, bias_ref, out_ref):
    # view == 3: sigmoid(b_u + b_t + b_i + (u @ T) . i)   (no *5 scaling)
    u = u_ref[...]           # (nf, TB)
    t = t_ref[...]           # (nf*nf, TB)
    it = i_ref[...]          # (nf, TB)
    acc = bias_ref[...]      # (1, TB)
    for j in range(nf):
        ut_j = u[0:1, :] * t[j:j + 1, :]
        for k in range(1, nf):
            ut_j = ut_j + u[k:k + 1, :] * t[k * nf + j:k * nf + j + 1, :]
        acc = acc + ut_j * it[j:j + 1, :]
    out_ref[...] = jax.nn.sigmoid(acc)


# ---------------------------------------------------------------------------
# Model wrapper (parameters in plain JAX; gathers are wrapper glue; compute
# in Pallas kernels).
# ---------------------------------------------------------------------------
class MVTF_Pallas:
    def __init__(self, n_users, n_attempts, n_items, n_factors=2, seed=1024):
        self.n_users = n_users
        self.n_attempts = n_attempts
        self.n_items = n_items
        self.n_factors = n_factors

        key = jax.random.PRNGKey(seed)
        ks = jax.random.split(key, 11)
        normal = lambda k, shape: jax.random.normal(k, shape, dtype=jnp.float32)

        # nn.Embedding default init ~ N(0, 1), deterministic via PRNGKey(seed).
        self.user_factors = normal(ks[0], (n_users, n_factors))
        self.time_factors = normal(ks[1], (n_attempts, n_factors * n_factors))
        self.item_factors = normal(ks[2], (n_items, n_factors))
        self.stress_item_factor = normal(ks[3], (1, n_factors))
        self.time_biases = normal(ks[4], (n_attempts, 1))
        self.stress_user_biases = normal(ks[5], (n_users, 1))
        self.stress_item_biases = normal(ks[6], (1, 1))
        self.rate_user_biases = normal(ks[7], (n_users, 1))
        self.rate_item_biases = normal(ks[8], (n_items, 1))
        self.done_user_biases = normal(ks[9], (n_users, 1))
        self.done_item_biases = normal(ks[10], (n_items, 1))

        self._call_cache = {}

    # -- build per-(view, padded batch) jitted callable -----------------------
    def _build_call(self, view, b_pad):
        nf = self.n_factors
        grid = (b_pad // _TB,)

        dense_spec = lambda rows: pl.BlockSpec((rows, _TB), lambda i: (0, i))
        fixed_spec = lambda rows: pl.BlockSpec((rows, _TB), lambda i: (0, 0))
        out_spec = pl.BlockSpec((1, _TB), lambda i: (0, i))
        out_shape = jax.ShapeDtypeStruct((1, b_pad), jnp.float32)
        cparams = pltpu.CompilerParams(dimension_semantics=("parallel",))

        if view == 1:
            kernel = functools.partial(_stress_kernel, nf)
            in_specs = [dense_spec(nf), dense_spec(nf * nf),
                        fixed_spec(nf), dense_spec(1)]
        elif view == 2:
            kernel = functools.partial(_rate_kernel, nf)
            in_specs = [dense_spec(nf), dense_spec(nf), dense_spec(1)]
        elif view == 3:
            kernel = functools.partial(_done_kernel, nf)
            in_specs = [dense_spec(nf), dense_spec(nf * nf),
                        dense_spec(nf), dense_spec(1)]
        else:
            raise ValueError(f"unknown view {view}")

        pcall = pl.pallas_call(
            kernel,
            out_shape=out_shape,
            grid=grid,
            in_specs=in_specs,
            out_specs=out_spec,
            compiler_params=cparams,
        )

        if view == 1:
            def fn(users, attempts, items):
                del items
                u_g = jnp.take(self.user_factors, users, axis=0).T        # (nf, B_pad)
                t_g = jnp.take(self.time_factors, attempts, axis=0).T     # (nf*nf, B_pad)
                s_b = jnp.broadcast_to(
                    self.stress_item_factor.reshape(nf, 1), (nf, _TB))
                bias = (jnp.take(self.stress_user_biases[:, 0], users) +
                        jnp.take(self.time_biases[:, 0], attempts) +
                        self.stress_item_biases[0, 0]).reshape(1, -1)
                return pcall(u_g, t_g, s_b, bias).reshape(-1)
        elif view == 2:
            def fn(users, attempts, items):
                del attempts
                u_g = jnp.take(self.user_factors, users, axis=0).T
                i_g = jnp.take(self.item_factors, items, axis=0).T
                bias = (jnp.take(self.rate_user_biases[:, 0], users) +
                        jnp.take(self.rate_item_biases[:, 0], items)).reshape(1, -1)
                return pcall(u_g, i_g, bias).reshape(-1)
        else:
            def fn(users, attempts, items):
                u_g = jnp.take(self.user_factors, users, axis=0).T
                t_g = jnp.take(self.time_factors, attempts, axis=0).T
                i_g = jnp.take(self.item_factors, items, axis=0).T
                bias = (jnp.take(self.done_user_biases[:, 0], users) +
                        jnp.take(self.time_biases[:, 0], attempts) +
                        jnp.take(self.done_item_biases[:, 0], items)).reshape(1, -1)
                return pcall(u_g, t_g, i_g, bias).reshape(-1)

        return jax.jit(fn)

    def _get_call(self, view, b_pad):
        key = (view, b_pad)
        fn = self._call_cache.get(key)
        if fn is None:
            fn = self._build_call(view, b_pad)
            self._call_cache[key] = fn
        return fn

    # -- public API -----------------------------------------------------------
    def forward_batch(self, users, attempts, items, view):
        """Batched predictions: (B,) int indices -> (B,) float32 predictions."""
        users = jnp.asarray(users, jnp.int32).reshape(-1)
        attempts = jnp.asarray(attempts, jnp.int32).reshape(-1)
        items = jnp.asarray(items, jnp.int32).reshape(-1)
        b = users.shape[0]

        # Bucket batch size to a multiple of the lane tile; pad with index 0
        # (always valid) and slice the padded predictions off afterwards.
        # NOTE: real indices are assumed in-range (torch nn.Embedding would
        # raise; jnp.take clamps out-of-range indices instead).
        b_pad = max(_TB, ((b + _TB - 1) // _TB) * _TB)
        pad = b_pad - b
        users_p = jnp.pad(users, (0, pad))
        attempts_p = jnp.pad(attempts, (0, pad))
        items_p = jnp.pad(items, (0, pad))

        out = self._get_call(view, b_pad)(users_p, attempts_p, items_p)
        return out[:b]

    def forward(self, user, attempt, item, view):
        """Single-sample forward matching MVTF_Torch: returns shape (1,)."""
        return self.forward_batch(
            jnp.asarray(user).reshape(-1)[:1],
            jnp.asarray(attempt).reshape(-1)[:1],
            jnp.asarray(item).reshape(-1)[:1],
            view)


# ---------------------------------------------------------------------------
# Pure-JAX reference (vectorized) for correctness checks.
# ---------------------------------------------------------------------------
def _ref_forward_batch(m, users, attempts, items, view):
    u = m.user_factors[users]                                   # (B, nf)
    if view == 1:
        t = m.time_factors[attempts].reshape(-1, m.n_factors, m.n_factors)
        ut = jnp.einsum('bk,bkj->bj', u, t)
        s = (m.stress_user_biases[users, 0] + m.time_biases[attempts, 0]
             + m.stress_item_biases[0, 0]
             + jnp.sum(ut * m.stress_item_factor[0], axis=-1))
        return jax.nn.sigmoid(s) * 5.0
    elif view == 2:
        i = m.item_factors[items]
        r = (m.rate_user_biases[users, 0] + m.rate_item_biases[items, 0]
             + jnp.sum(u * i, axis=-1))
        return jax.nn.sigmoid(r) * 5.0
    else:
        t = m.time_factors[attempts].reshape(-1, m.n_factors, m.n_factors)
        i = m.item_factors[items]
        ut = jnp.einsum('bk,bkj->bj', u, t)
        p = (m.done_user_biases[users, 0] + m.time_biases[attempts, 0]
             + m.done_item_biases[items, 0] + jnp.sum(ut * i, axis=-1))
        return jax.nn.sigmoid(p)


if __name__ == "__main__":
    n_users, n_attempts, n_items, n_factors = 16, 8, 12, 4
    model = MVTF_Pallas(n_users, n_attempts, n_items, n_factors, seed=1024)

    key = jax.random.PRNGKey(0)
    ku, ka, ki, kbu, kba, kbi = jax.random.split(key, 6)

    # -- single-sample forward (same semantics as MVTF_Torch: shape (1,)) ----
    user = jax.random.randint(ku, (1,), 0, n_users, dtype=jnp.int32)
    attempt = jax.random.randint(ka, (1,), 0, n_attempts, dtype=jnp.int32)
    item = jax.random.randint(ki, (1,), 0, n_items, dtype=jnp.int32)
    for view in (1, 2, 3):
        out = jax.block_until_ready(model.forward(user, attempt, item, view))
        ref = _ref_forward_batch(model, user, attempt, item, view)
        assert out.shape == (1,), (view, out.shape)
        assert jnp.allclose(out, ref, atol=1e-4, rtol=1e-4), (view, out, ref)

    # -- batched forward: multiple lane tiles + ragged tail -------------------
    B = 130  # -> padded to 256, grid of 2 tiles, exercises tail padding
    users = jax.random.randint(kbu, (B,), 0, n_users, dtype=jnp.int32)
    attempts = jax.random.randint(kba, (B,), 0, n_attempts, dtype=jnp.int32)
    items = jax.random.randint(kbi, (B,), 0, n_items, dtype=jnp.int32)
    for view in (1, 2, 3):
        out = jax.block_until_ready(
            model.forward_batch(users, attempts, items, view))
        ref = _ref_forward_batch(model, users, attempts, items, view)
        assert out.shape == (B,), (view, out.shape)
        assert jnp.allclose(out, ref, atol=1e-4, rtol=1e-4), (view, out, ref)

    print("KERNEL_OK")
</pallas_src>

<mosaic_0001>
module attributes {stable_mosaic.version = 11 : i64} {
  func.func @_stress_kernel(%arg0: i32, %arg1: memref<4x128xf32, #tpu.memory_space<vmem>>, %arg2: memref<16x128xf32, #tpu.memory_space<vmem>>, %arg3: memref<4x128xf32, #tpu.memory_space<vmem>>, %arg4: memref<1x128xf32, #tpu.memory_space<vmem>>, %arg5: memref<1x128xf32, #tpu.memory_space<vmem>>) attributes {dimension_semantics = [#tpu.dimension_semantics<parallel>], iteration_bounds = array<i64: 1>, scalar_prefetch = 0 : i64, scratch_operands = 0 : i64, tpu.core_type = #tpu.core_type<tc>, window_params = [{transform_indices = @transform_0, window_bounds = array<i64: 4, 128>}, {transform_indices = @transform_1, window_bounds = array<i64: 16, 128>}, {pipeline_mode = #tpu.pipeline_mode<synchronous>, transform_indices = @transform_2, window_bounds = array<i64: 4, 128>}, {transform_indices = @transform_3, window_bounds = array<i64: 1, 128>}, {transform_indices = @transform_4, window_bounds = array<i64: 1, 128>}]} {
    %c0 = arith.constant 0 : index
    %c0_0 = arith.constant 0 : index
    %0 = vector.load %arg1[%c0, %c0_0] : memref<4x128xf32, #tpu.memory_space<vmem>>, vector<4x128xf32>
    %c0_1 = arith.constant 0 : index
    %c0_2 = arith.constant 0 : index
    %1 = vector.load %arg2[%c0_1, %c0_2] : memref<16x128xf32, #tpu.memory_space<vmem>>, vector<16x128xf32>
    %c0_3 = arith.constant 0 : index
    %c0_4 = arith.constant 0 : index
    %2 = vector.load %arg3[%c0_3, %c0_4] : memref<4x128xf32, #tpu.memory_space<vmem>>, vector<4x128xf32>
    %c0_5 = arith.constant 0 : index
    %c0_6 = arith.constant 0 : index
    %3 = vector.load %arg4[%c0_5, %c0_6] : memref<1x128xf32, #tpu.memory_space<vmem>>, vector<1x128xf32>
    %4 = vector.extract_strided_slice %0 {offsets = [0, 0], sizes = [1, 128], strides = [1, 1]} : vector<4x128xf32> to vector<1x128xf32>
    %5 = vector.extract_strided_slice %1 {offsets = [0, 0], sizes = [1, 128], strides = [1, 1]} : vector<16x128xf32> to vector<1x128xf32>
    %6 = arith.mulf %4, %5 : vector<1x128xf32>
    %7 = vector.extract_strided_slice %0 {offsets = [1, 0], sizes = [1, 128], strides = [1, 1]} : vector<4x128xf32> to vector<1x128xf32>
    %8 = vector.extract_strided_slice %1 {offsets = [4, 0], sizes = [1, 128], strides = [1, 1]} : vector<16x128xf32> to vector<1x128xf32>
    %9 = arith.mulf %7, %8 : vector<1x128xf32>
    %10 = arith.addf %6, %9 : vector<1x128xf32>
    %11 = vector.extract_strided_slice %0 {offsets = [2, 0], sizes = [1, 128], strides = [1, 1]} : vector<4x128xf32> to vector<1x128xf32>
    %12 = vector.extract_strided_slice %1 {offsets = [8, 0], sizes = [1, 128], strides = [1, 1]} : vector<16x128xf32> to vector<1x128xf32>
    %13 = arith.mulf %11, %12 : vector<1x128xf32>
    %14 = arith.addf %10, %13 : vector<1x128xf32>
    %15 = vector.extract_strided_slice %0 {offsets = [3, 0], sizes = [1, 128], strides = [1, 1]} : vector<4x128xf32> to vector<1x128xf32>
    %16 = vector.extract_strided_slice %1 {offsets = [12, 0], sizes = [1, 128], strides = [1, 1]} : vector<16x128xf32> to vector<1x128xf32>
    %17 = arith.mulf %15, %16 : vector<1x128xf32>
    %18 = arith.addf %14, %17 : vector<1x128xf32>
    %19 = vector.extract_strided_slice %2 {offsets = [0, 0], sizes = [1, 128], strides = [1, 1]} : vector<4x128xf32> to vector<1x128xf32>
    %20 = arith.mulf %18, %19 : vector<1x128xf32>
    %21 = arith.addf %3, %20 : vector<1x128xf32>
    %22 = vector.extract_strided_slice %0 {offsets = [0, 0], sizes = [1, 128], strides = [1, 1]} : vector<4x128xf32> to vector<1x128xf32>
    %23 = vector.extract_strided_slice %1 {offsets = [1, 0], sizes = [1, 128], strides = [1, 1]} : vector<16x128xf32> to vector<1x128xf32>
    %24 = arith.mulf %22, %23 : vector<1x128xf32>
    %25 = vector.extract_strided_slice %0 {offsets = [1, 0], sizes = [1, 128], strides = [1, 1]} : vector<4x128xf32> to vector<1x128xf32>
    %26 = vector.extract_strided_slice %1 {offsets = [5, 0], sizes = [1, 128], strides = [1, 1]} : vector<16x128xf32> to vector<1x128xf32>
    %27 = arith.mulf %25, %26 : vector<1x128xf32>
    %28 = arith.addf %24, %27 : vector<1x128xf32>
    %29 = vector.extract_strided_slice %0 {offsets = [2, 0], sizes = [1, 128], strides = [1, 1]} : vector<4x128xf32> to vector<1x128xf32>
    %30 = vector.extract_strided_slice %1 {offsets = [9, 0], sizes = [1, 128], strides = [1, 1]} : vector<16x128xf32> to vector<1x128xf32>
    %31 = arith.mulf %29, %30 : vector<1x128xf32>
    %32 = arith.addf %28, %31 : vector<1x128xf32>
    %33 = vector.extract_strided_slice %0 {offsets = [3, 0], sizes = [1, 128], strides = [1, 1]} : vector<4x128xf32> to vector<1x128xf32>
    %34 = vector.extract_strided_slice %1 {offsets = [13, 0], sizes = [1, 128], strides = [1, 1]} : vector<16x128xf32> to vector<1x128xf32>
    %35 = arith.mulf %33, %34 : vector<1x128xf32>
    %36 = arith.addf %32, %35 : vector<1x128xf32>
    %37 = vector.extract_strided_slice %2 {offsets = [1, 0], sizes = [1, 128], strides = [1, 1]} : vector<4x128xf32> to vector<1x128xf32>
    %38 = arith.mulf %36, %37 : vector<1x128xf32>
    %39 = arith.addf %21, %38 : vector<1x128xf32>
    %40 = vector.extract_strided_slice %0 {offsets = [0, 0], sizes = [1, 128], strides = [1, 1]} : vector<4x128xf32> to vector<1x128xf32>
    %41 = vector.extract_strided_slice %1 {offsets = [2, 0], sizes = [1, 128], strides = [1, 1]} : vector<16x128xf32> to vector<1x128xf32>
    %42 = arith.mulf %40, %41 : vector<1x128xf32>
    %43 = vector.extract_strided_slice %0 {offsets = [1, 0], sizes = [1, 128], strides = [1, 1]} : vector<4x128xf32> to vector<1x128xf32>
    %44 = vector.extract_strided_slice %1 {offsets = [6, 0], sizes = [1, 128], strides = [1, 1]} : vector<16x128xf32> to vector<1x128xf32>
    %45 = arith.mulf %43, %44 : vector<1x128xf32>
    %46 = arith.addf %42, %45 : vector<1x128xf32>
    %47 = vector.extract_strided_slice %0 {offsets = [2, 0], sizes = [1, 128], strides = [1, 1]} : vector<4x128xf32> to vector<1x128xf32>
    %48 = vector.extract_strided_slice %1 {offsets = [10, 0], sizes = [1, 128], strides = [1, 1]} : vector<16x128xf32> to vector<1x128xf32>
    %49 = arith.mulf %47, %48 : vector<1x128xf32>
    %50 = arith.addf %46, %49 : vector<1x128xf32>
    %51 = vector.extract_strided_slice %0 {offsets = [3, 0], sizes = [1, 128], strides = [1, 1]} : vector<4x128xf32> to vector<1x128xf32>
    %52 = vector.extract_strided_slice %1 {offsets = [14, 0], sizes = [1, 128], strides = [1, 1]} : vector<16x128xf32> to vector<1x128xf32>
    %53 = arith.mulf %51, %52 : vector<1x128xf32>
    %54 = arith.addf %50, %53 : vector<1x128xf32>
    %55 = vector.extract_strided_slice %2 {offsets = [2, 0], sizes = [1, 128], strides = [1, 1]} : vector<4x128xf32> to vector<1x128xf32>
    %56 = arith.mulf %54, %55 : vector<1x128xf32>
    %57 = arith.addf %39, %56 : vector<1x128xf32>
    %58 = vector.extract_strided_slice %0 {offsets = [0, 0], sizes = [1, 128], strides = [1, 1]} : vector<4x128xf32> to vector<1x128xf32>
    %59 = vector.extract_strided_slice %1 {offsets = [3, 0], sizes = [1, 128], strides = [1, 1]} : vector<16x128xf32> to vector<1x128xf32>
    %60 = arith.mulf %58, %59 : vector<1x128xf32>
    %61 = vector.extract_strided_slice %0 {offsets = [1, 0], sizes = [1, 128], strides = [1, 1]} : vector<4x128xf32> to vector<1x128xf32>
    %62 = vector.extract_strided_slice %1 {offsets = [7, 0], sizes = [1, 128], strides = [1, 1]} : vector<16x128xf32> to vector<1x128xf32>
    %63 = arith.mulf %61, %62 : vector<1x128xf32>
    %64 = arith.addf %60, %63 : vector<1x128xf32>
    %65 = vector.extract_strided_slice %0 {offsets = [2, 0], sizes = [1, 128], strides = [1, 1]} : vector<4x128xf32> to vector<1x128xf32>
    %66 = vector.extract_strided_slice %1 {offsets = [11, 0], sizes = [1, 128], strides = [1, 1]} : vector<16x128xf32> to vector<1x128xf32>
    %67 = arith.mulf %65, %66 : vector<1x128xf32>
    %68 = arith.addf %64, %67 : vector<1x128xf32>
    %69 = vector.extract_strided_slice %0 {offsets = [3, 0], sizes = [1, 128], strides = [1, 1]} : vector<4x128xf32> to vector<1x128xf32>
    %70 = vector.extract_strided_slice %1 {offsets = [15, 0], sizes = [1, 128], strides = [1, 1]} : vector<16x128xf32> to vector<1x128xf32>
    %71 = arith.mulf %69, %70 : vector<1x128xf32>
    %72 = arith.addf %68, %71 : vector<1x128xf32>
    %73 = vector.extract_strided_slice %2 {offsets = [3, 0], sizes = [1, 128], strides = [1, 1]} : vector<4x128xf32> to vector<1x128xf32>
    %74 = arith.mulf %72, %73 : vector<1x128xf32>
    %75 = arith.addf %57, %74 : vector<1x128xf32>
    %76 = arith.negf %75 : vector<1x128xf32>
    %77 = math.exp %76 : vector<1x128xf32>
    %cst = arith.constant 1.000000e+00 : f32
    %78 = vector.broadcast %cst : f32 to vector<1x128xf32>
    %79 = arith.addf %78, %77 : vector<1x128xf32>
    %80 = arith.divf %78, %79 : vector<1x128xf32>
    %cst_7 = arith.constant 5.000000e+00 : f32
    %81 = vector.broadcast %cst_7 : f32 to vector<1x128xf32>
    %82 = arith.mulf %80, %81 : vector<1x128xf32>
    %c0_8 = arith.constant 0 : index
    %c0_9 = arith.constant 0 : index
    %83 = vector.load %arg5[%c0_8, %c0_9] : memref<1x128xf32, #tpu.memory_space<vmem>>, vector<1x128xf32>
    tpu.vector_store %arg5[%c0_8, %c0_9], %82 {strides = array<i32>} : memref<1x128xf32, #tpu.memory_space<vmem>>, vector<1x128xf32>,
    return
  }
  func.func @transform_0(%arg0: i32) -> (i32, i32) {
    %c0_i32 = arith.constant 0 : i32
    %c0_i32_0 = arith.constant 0 : i32
    return %c0_i32, %arg0 : i32, i32
  }
  func.func @transform_1(%arg0: i32) -> (i32, i32) {
    %c0_i32 = arith.constant 0 : i32
    %c0_i32_0 = arith.constant 0 : i32
    return %c0_i32, %arg0 : i32, i32
  }
  func.func @transform_2(%arg0: i32) -> (i32, i32) {
    %c0_i32 = arith.constant 0 : i32
    %c0_i32_0 = arith.constant 0 : i32
    %c0_i32_1 = arith.constant 0 : i32
    return %c0_i32, %c0_i32_0 : i32, i32
  }
  func.func @transform_3(%arg0: i32) -> (i32, i32) {
    %c0_i32 = arith.constant 0 : i32
    %c0_i32_0 = arith.constant 0 : i32
    return %c0_i32, %arg0 : i32, i32
  }
  func.func @transform_4(%arg0: i32) -> (i32, i32) {
    %c0_i32 = arith.constant 0 : i32
    %c0_i32_0 = arith.constant 0 : i32
    return %c0_i32, %arg0 : i32, i32
  }
}

</mosaic_0001>

<bundles_post_ra>
// kernel: fn.1
= control target key start
LH: loop header
LB: loop body
LE: loop exit
PB: predicated region body
PF: predicated region fallthrough
CT: control target
= control target key end

     0   :  { %s238_s0 = inlined_call_operand.vmem [shape: f32[4,128], index: 0, kind: input, shape index: {}]   ;;  %s239_s1 = inlined_call_operand.vmem [shape: f32[16,128], index: 1, kind: input, shape index: {}]   ;;  %s240_s2 = inlined_call_operand.vmem [shape: f32[4,128], index: 2, kind: input, shape index: {}]   ;;  %s241_s3 = inlined_call_operand.vmem [shape: f32[1,128], index: 3, kind: input, shape index: {}]   ;;  %s242_s4 = inlined_call_operand.hbm [shape: f32[1,128], index: 4, kind: output, shape index: {}]  }
   0x1   :  { %v18_v0 = vld [vmem:[%s238_s0] sm:$0xf]  ;;  %v20_v2 = vld [vmem:[%s239_s1 + $0x8] sm:$0xff] }
   0x2   :  { %v19_v1 = vld [vmem:[%s239_s1] sm:$0xff]  ;;  %v33_v4 = vrot.slane %v20_v2, 6  ;;  %v40_v5 = vrot.slane %v20_v2, 1  ;;  %v59_v8 = vrot.slane %v20_v2, 7 }
   0x3   :  { %v25_v3 = vrot.slane %v19_v1, 3  ;;  %v49_v6 = vrot.slane %v19_v1, 1  ;;  %v52_v7 = vrot.slane %v19_v1, 4 }
   0x4   :  { %9 = vsyncpa [#allocation3], 0  ;;  %v23_v9 = vmul.f32 %v19_v1, %v18_v0  ;;  %v35_v11 = vmul.f32 %v33_v4, %v18_v0  ;;  %v66_v12 = vrot.slane %v20_v2, 2  ;;  %v42_v13 = vmul.f32 %v40_v5, %v18_v0  ;;  %v21_v21 = vld [vmem:[%s240_s2] sm:$0xf]  ;;  %s153_s25 = sshll.u32 %s242_s4, 4  ;;  %s154_s25 = int_to_ptr.hbm [resolvable:$true] %s153_s25 }
   0x5   :  { %v27_v10 = vmul.f32 %v25_v3, %v18_v0  ;;  %v51_v14 = vmul.f32 %v49_v6, %v18_v0  ;;  %v54_v15 = vmul.f32 %v52_v7, %v18_v0  ;;  %v61_v16 = vmul.f32 %v59_v8, %v18_v0  ;;  %v22_v44 = vld [vmem:[%s241_s3] sm:$0x1]  ;;  %s194_s3 = smov [#allocation2]  }
   0x6   :  { %v37_v18 = vrot.slane %v35_v11, 2  ;;  %v68_v19 = vmul.f32 %v66_v12, %v18_v0  ;;  %v78_v20 = vrot.slane %v19_v1, 2  ;;  %v81_v24 = vrot.slane %v19_v1, 5  ;;  %s151_s22 = sshll.u32 %s194_s3, 4  ;;  %s152_s22 = int_to_ptr.vmem [resolvable:$true] %s151_s22 }
   0x7   :  { %v29_v17 = vrot.slane %v27_v10, 1  ;;  %v56_v22 = vrot.slane %v54_v15, 1  ;;  %v63_v23 = vrot.slane %v61_v16, 2  ;;  %v88_v25 = vmul.f32 %v20_v2, %v18_v0 }
   0x8   :  { %v44_v27 = vrot.slane %v42_v13, 3  ;;  %v70_v28 = vrot.slane %v68_v19, 3  ;;  %v80_v30 = vmul.f32 %v78_v20, %v18_v0  ;;  %v83_v31 = vmul.f32 %v81_v24, %v18_v0 }
   0x9   :  { %v31_v26 = vadd.f32 %v29_v17, %v23_v9  ;;  %v58_v29 = vadd.f32 %v56_v22, %v51_v14  ;;  %v93_v32 = vrot.slane %v20_v2, 3  ;;  %v74_v34 = vrot.slane %v21_v21, 1 }
   0xa   :  { %v104_v35 = vrot.slane %v19_v1, 6  ;;  %v114_v36 = vrot.slane %v20_v2, 4  ;;  %v85_v38 = vrot.slane %v83_v31, 1  ;;  %v90_v39 = vrot.slane %v88_v25, 2 }
   0xb   :  { %v39_v33 = vadd.f32 %v37_v18, %v31_v26  ;;  %v65_v37 = vadd.f32 %v63_v23, %v58_v29  ;;  %v95_v40 = vmul.f32 %v93_v32, %v18_v0  ;;  %v111_v50 = vrot.slane %v42_v13, 2 }
   0xc   :  { %v106_v42 = vmul.f32 %v104_v35, %v18_v0  ;;  %v116_v43 = vmul.f32 %v114_v36, %v18_v0  ;;  %v87_v46 = vadd.f32 %v85_v38, %v80_v30  ;;  %v100_v53 = vrot.slane %v21_v21, 2 }
   0xd   :  { %v46_v41 = vadd.f32 %v44_v27, %v39_v33  ;;  %v72_v45 = vadd.f32 %v70_v28, %v65_v37  ;;  %v97_v47 = vrot.slane %v95_v40, 3  ;;  %v121_v60 = vrot.slane %v21_v21, 3 }
   0xe   :  { %v108_v49 = vrot.slane %v106_v42, 1  ;;  %v92_v52 = vadd.f32 %v90_v39, %v87_v46  ;;  %v118_v56 = vrot.slane %v116_v43, 3 }
   0xf   :  { %v47_v48 = vmul.f32 %v46_v41, %v21_v21  ;;  %v76_v51 = vmul.f32 %v74_v34, %v72_v45 }
  0x10   :  { %v110_v55 = vadd.f32 %v108_v49, %v27_v10  ;;  %v99_v57 = vadd.f32 %v97_v47, %v92_v52 }
  0x11   :  { %v48_v54 = vadd.f32 %v47_v48, %v22_v44 }
  0x12   :  { %v113_v59 = vadd.f32 %v111_v50, %v110_v55  ;;  %v102_v61 = vmul.f32 %v100_v53, %v99_v57 }
  0x13   :  { %v77_v58 = vadd.f32 %v76_v51, %v48_v54 }
  0x14   :  { %v120_v62 = vadd.f32 %v118_v56, %v113_v59 }
  0x15   :  { %v103_v63 = vadd.f32 %v102_v61, %v77_v58 }
  0x16   :  { %v123_v0 = vmul.f32 %v121_v60, %v120_v62 }
  0x18   :  { %v124_v1 = vadd.f32 %v123_v0, %v103_v63 }
  0x1a   :  { %v162_v2 = vmul.f32 -1.442695, %v124_v1 }
  0x1c   :  { %164 = vpow2.f32 %v162_v2 }
  0x22   :  { %v165_v3 = vpop.eup %164 }
  0x23   :  { %v128_v4 = vadd.f32 1.0, %v165_v3 }
  0x25   :  { %166 = vrcp.f32 %v128_v4  ;;  %v140_v7 = vand.u32 2147483648, %v128_v4  ;;  %vm134_vm0 = vweird.f32 %v128_v4  ;;  %v138_v9 = vand.u32 2147483647, %v128_v4 }
  0x27   :  { %v141_v11 = vor.u32 1.1754944e-38, %v140_v7  ;;  %vm139_vm3 = vcmp.eq.f32.partialorder %v138_v9, 8.507059e+37 }
  0x2b   :  { %v167_v5 = vpop.eup %166 }
  0x2c   :  { %v130_v6 = vmul.f32 %v167_v5, %v128_v4  ;;  %vm135_vm1 = vweird.f32 %v167_v5 }
  0x2d   :  { %vm136_vm2 = vmor %vm134_vm0, %vm135_vm1 }
  0x2e   :  { %v131_v8 = vsub.f32 1.0, %v130_v6 }
  0x30   :  { %v132_v10 = vmul.f32 %v167_v5, %v131_v8 }
  0x32   :  { %v133_v12 = vadd.f32 %v167_v5, %v132_v10 }
  0x34   :  { %v137_v13 = vsel %vm136_vm2, %v167_v5, %v133_v12 }
  0x35   :  { %v142_v14 = vsel %vm139_vm3, %v141_v11, %v137_v13 }
  0x36   :  { %v144_v15 = vmul.f32 5.0, %v142_v14 }
  0x38   :  { %145 = vst [vmem:[#allocation2] sm:$0x1] %v144_v15 }
  0x39   :  { %156 = dma.vmem_to_hbm [thread:$0]  %s152_s22, 16, %s154_s25, [#allocation3]  }
  0x3a   :  { %192 = dma.done.wait [#allocation3], 16  }
  0x3b   :  { %193 = vsyncadd [#allocation3], 4294967280 }
  0x3c   :  { %161 = vsyncpa [#allocation3], 1 }

</bundles_post_ra>
